<compile_context>
chip_gen: v6e
topology: v6e:2x2x1
jax: 0.10.0
libtpu: 0.0.40
codegen_flags: <defaults>
</compile_context>

<pallas_src>
import numpy as np
import jax
import jax.numpy as jnp
from jax import lax
from jax.experimental import pallas as pl
from jax.experimental.pallas import tpu as pltpu

EPS = 1e-5  # nn.LayerNorm default


# ------------------------------ Pallas kernel -------------------------------
def patch_merging_kernel(x_ref, gb_ref, w_ref, o_ref):
    """Fused LayerNorm(4C) + Linear(4C -> 2C) on lane-dense merged tokens.

    x_ref : (NTOK, 4C)  merged tokens, channels already in [x0|x1|x2|x3] order
    gb_ref: (2, 4C)     row 0 = gamma, row 1 = beta   (static slices are free)
    w_ref : (4C, 2C)    reduction weight (no bias)
    o_ref : (NTOK, 2C)
    """
    x = x_ref[...]                                            # (NTOK, 4C) f32
    c4 = x_ref.shape[-1]
    inv_c4 = 1.0 / c4

    # LayerNorm over the (lane-dense) 4C channel axis.
    mu = jnp.sum(x, axis=-1, keepdims=True) * inv_c4
    d = x - mu
    var = jnp.sum(d * d, axis=-1, keepdims=True) * inv_c4
    xn = d * lax.rsqrt(var + jnp.float32(EPS)) * gb_ref[0:1, :] + gb_ref[1:2, :]

    # Single full-width MXU dot: (NTOK, 4C) @ (4C, 2C).
    o_ref[...] = jnp.dot(xn, w_ref[...], preferred_element_type=jnp.float32)


# ------------------------------ JAX wrapper ---------------------------------
def patch_merging_forward(x, gamma, beta, w_red, *, input_resolution):
    """x: (B, H*W, C) -> (B, H/2*W/2, 2C), identical to the PyTorch module."""
    H, W = input_resolution
    B, L, C = x.shape
    assert L == H * W and H % 2 == 0 and W % 2 == 0
    H2, W2 = H // 2, W // 2
    C4, C2 = 4 * C, 2 * C
    NTOK = B * H2 * W2

    # Layout plumbing (wrapper side, not compute): gather the 2x2 neighbourhood
    # so the merged 4C channel axis is lane-dense and already in the reference
    # [x0 | x1 | x2 | x3] order:  (b, hi, hp, wi, wp, c) -> (b, hi, wi, wp, hp, c)
    # gives channel = (wp*2 + hp)*C + c, i.e. exactly torch.cat([x0,x1,x2,x3]).
    x4 = (x.reshape(B, H2, 2, W2, 2, C)
            .transpose(0, 1, 3, 4, 2, 5)
            .reshape(NTOK, C4))

    gb = jnp.stack([gamma, beta])                       # (2, 4C): one DMA, not four

    vmem = pl.BlockSpec(memory_space=pltpu.MemorySpace.VMEM)
    out = pl.pallas_call(
        patch_merging_kernel,
        out_shape=jax.ShapeDtypeStruct((NTOK, C2), jnp.float32),
        in_specs=[vmem, vmem, vmem],                    # whole arrays in VMEM, no grid
        out_specs=vmem,
    )(x4, gb, w_red)

    return out.reshape(B, H2 * W2, C2)


# ---------------------------- pure-JAX reference ----------------------------
def reference_forward(x, gamma, beta, w_red, *, input_resolution):
    H, W = input_resolution
    B, L, C = x.shape
    xr = x.reshape(B, H, W, C)
    x0 = xr[:, 0::2, 0::2, :]
    x1 = xr[:, 1::2, 0::2, :]
    x2 = xr[:, 0::2, 1::2, :]
    x3 = xr[:, 1::2, 1::2, :]
    xm = jnp.concatenate([x0, x1, x2, x3], axis=-1).reshape(B, (H // 2) * (W // 2), 4 * C)
    mu = jnp.mean(xm, axis=-1, keepdims=True)
    var = jnp.mean((xm - mu) ** 2, axis=-1, keepdims=True)
    xn = (xm - mu) / jnp.sqrt(var + EPS) * gamma + beta
    return xn @ w_red


# ----------------------------------- main ------------------------------------
if __name__ == "__main__":
    B, H, W, C = 2, 16, 16, 32
    C4, C2 = 4 * C, 2 * C

    key = jax.random.PRNGKey(0)
    kx, kg, kb, kw = jax.random.split(key, 4)
    x = jax.random.normal(kx, (B, H * W, C), jnp.float32)
    gamma = (1.0 + 0.1 * jax.random.normal(kg, (C4,))).astype(jnp.float32)
    beta = (0.1 * jax.random.normal(kb, (C4,))).astype(jnp.float32)
    w_red = (jax.random.normal(kw, (C4, C2)) * 0.02).astype(jnp.float32)

    fwd = jax.jit(patch_merging_forward, static_argnames=("input_resolution",))
    out = jax.block_until_ready(fwd(x, gamma, beta, w_red, input_resolution=(H, W)))

    ref = reference_forward(x, gamma, beta, w_red, input_resolution=(H, W))
    np.testing.assert_allclose(np.asarray(out), np.asarray(ref), atol=1e-4, rtol=1e-4)

    print("KERNEL_OK")
</pallas_src>

<mosaic_0001>
module attributes {stable_mosaic.version = 11 : i64} {
  func.func @patch_merging_kernel(%arg0: memref<128x128xf32, #tpu.memory_space<vmem>>, %arg1: memref<2x128xf32, #tpu.memory_space<vmem>>, %arg2: memref<128x64xf32, #tpu.memory_space<vmem>>, %arg3: memref<128x64xf32, #tpu.memory_space<vmem>>) attributes {dimension_semantics = [], scalar_prefetch = 0 : i64, scratch_operands = 0 : i64, tpu.core_type = #tpu.core_type<tc>} {
    %c0 = arith.constant 0 : index
    %c0_0 = arith.constant 0 : index
    %0 = vector.load %arg0[%c0, %c0_0] : memref<128x128xf32, #tpu.memory_space<vmem>>, vector<128x128xf32>
    %cst = arith.constant dense<0.000000e+00> : vector<128xf32>
    %1 = vector.multi_reduction <add>, %0, %cst [1] : vector<128x128xf32> to vector<128xf32>
    %2 = vector.shape_cast %1 : vector<128xf32> to vector<128x1xf32>
    %cst_1 = arith.constant 7.812500e-03 : f32
    %3 = vector.broadcast %cst_1 : f32 to vector<128x1xf32>
    %4 = arith.mulf %2, %3 : vector<128x1xf32>
    %5 = vector.broadcast %4 : vector<128x1xf32> to vector<128x128xf32>
    %6 = arith.subf %0, %5 : vector<128x128xf32>
    %7 = arith.mulf %6, %6 : vector<128x128xf32>
    %cst_2 = arith.constant dense<0.000000e+00> : vector<128xf32>
    %8 = vector.multi_reduction <add>, %7, %cst_2 [1] : vector<128x128xf32> to vector<128xf32>
    %9 = vector.shape_cast %8 : vector<128xf32> to vector<128x1xf32>
    %cst_3 = arith.constant 7.812500e-03 : f32
    %10 = vector.broadcast %cst_3 : f32 to vector<128x1xf32>
    %11 = arith.mulf %9, %10 : vector<128x1xf32>
    %cst_4 = arith.constant 9.99999974E-6 : f32
    %12 = vector.broadcast %cst_4 : f32 to vector<128x1xf32>
    %13 = arith.addf %11, %12 : vector<128x1xf32>
    %14 = math.rsqrt %13 : vector<128x1xf32>
    %15 = vector.broadcast %14 : vector<128x1xf32> to vector<128x128xf32>
    %16 = arith.mulf %6, %15 : vector<128x128xf32>
    %c0_5 = arith.constant 0 : index
    %c0_6 = arith.constant 0 : index
    %17 = vector.load %arg1[%c0_5, %c0_6] : memref<2x128xf32, #tpu.memory_space<vmem>>, vector<1x128xf32>
    %18 = vector.broadcast %17 : vector<1x128xf32> to vector<128x128xf32>
    %19 = arith.mulf %16, %18 : vector<128x128xf32>
    %c1 = arith.constant 1 : index
    %c0_7 = arith.constant 0 : index
    %20 = vector.load %arg1[%c1, %c0_7] : memref<2x128xf32, #tpu.memory_space<vmem>>, vector<1x128xf32>
    %21 = vector.broadcast %20 : vector<1x128xf32> to vector<128x128xf32>
    %22 = arith.addf %19, %21 : vector<128x128xf32>
    %c0_8 = arith.constant 0 : index
    %c0_9 = arith.constant 0 : index
    %23 = vector.load %arg2[%c0_8, %c0_9] : memref<128x64xf32, #tpu.memory_space<vmem>>, vector<128x64xf32>
    %cst_10 = arith.constant dense<0.000000e+00> : vector<128x64xf32>
    %24 = tpu.matmul %22, %23, %cst_10 {dimension_numbers = #tpu.dot_dimension_numbers<[1], [0], [0], [1], [0, 0, 1, 1], [], []>} : vector<128x128xf32>, vector<128x64xf32>, vector<128x64xf32> -> vector<128x64xf32>
    %c0_11 = arith.constant 0 : index
    %c0_12 = arith.constant 0 : index
    %25 = vector.load %arg3[%c0_11, %c0_12] : memref<128x64xf32, #tpu.memory_space<vmem>>, vector<128x64xf32>
    tpu.vector_store %arg3[%c0_11, %c0_12], %24 {strides = array<i32>} : memref<128x64xf32, #tpu.memory_space<vmem>>, vector<128x64xf32>,
    return
  }
}

</mosaic_0001>

<bundles_post_ra>
// kernel: patch_merging_forward.1
= control target key start
LH: loop header
LB: loop body
LE: loop exit
PB: predicated region body
PF: predicated region fallthrough
CT: control target
= control target key end

     0   :  { %s914_s0 = inlined_call_operand.vmem [shape: f32[128,128], index: 0, kind: input, shape index: {}]   ;;  %s915_s1 = inlined_call_operand.vmem [shape: f32[2,128], index: 1, kind: input, shape index: {}]   ;;  %s916_s2 = inlined_call_operand.vmem [shape: f32[128,64], index: 2, kind: input, shape index: {}]   ;;  %s917_s3 = inlined_call_operand.hbm [shape: f32[128,64], index: 3, kind: output, shape index: {}]  }
   0x1   :  { %v15_v0 = vld [vmem:[%s914_s0] sm:$0xff]  ;;  %v16_v1 = vld [vmem:[%s914_s0 + $0x8] sm:$0xff] }
   0x2   :  { %31 = vadd.xlane.f32.xlu0 %v15_v0  ;;  %33 = vadd.xlane.f32.xlu1 %v16_v1  ;;  %v23_v2 = vld [vmem:[%s914_s0 + $0x40] sm:$0xff]  ;;  %v24_v3 = vld [vmem:[%s914_s0 + $0x48] sm:$0xff] }
   0x6   :  { %47 = vadd.xlane.f32.xlu0 %v23_v2  ;;  %49 = vadd.xlane.f32.xlu1 %v24_v3 }
   0x7   :  { %8 = vsyncpa [#allocation3], 0  ;;  %v17_v4 = vld [vmem:[%s914_s0 + $0x10] sm:$0xff]  ;;  %v18_v6 = vld [vmem:[%s914_s0 + $0x18] sm:$0xff]  ;;  %vm410_vm0 = vcmask 523264  }
   0x8   :  { %v25_v5 = vld [vmem:[%s914_s0 + $0x50] sm:$0xff]  ;;  %v26_v7 = vld [vmem:[%s914_s0 + $0x58] sm:$0xff]  ;;  %v672_v8 = vld [vmem:[%s914_s0 + $0x20] sm:$0xff] }
   0x9   :  { %v677_v9 = vld [vmem:[%s914_s0 + $0x60] sm:$0xff]  ;;  %v684_v10 = vld [vmem:[%s914_s0 + $0x28] sm:$0xff]  ;;  %v696_v12 = vld [vmem:[%s914_s0 + $0x30] sm:$0xff] }
   0xa   :  { %35 = vadd.xlane.f32.xlu0 %v17_v4  ;;  %51 = vadd.xlane.f32.xlu1 %v25_v5  ;;  %v689_v11 = vld [vmem:[%s914_s0 + $0x68] sm:$0xff]  ;;  %v701_v13 = vld [vmem:[%s914_s0 + $0x70] sm:$0xff]  ;;  %v708_v14 = vld [vmem:[%s914_s0 + $0x38] sm:$0xff] }
   0xb   :  { %v713_v15 = vld [vmem:[%s914_s0 + $0x78] sm:$0xff]  ;;  %v263_v17 = vld [vmem:[%s916_s2 + $0x70] sm:$0xff]  ;;  %v262_v50 = vld [vmem:[%s916_s2 + $0x68] sm:$0xff] }
   0xc   :  { %v264_v16 = vld [vmem:[%s916_s2 + $0x78] sm:$0xff]  ;;  %v261_v54 = vld [vmem:[%s916_s2 + $0x60] sm:$0xff] }
   0xd   :  { %477 = vmatprep.subr.mxu0 %v264_v16  ;;  %533 = vmatprep.subr.mxu1 %v264_v16  ;;  %v260_v63 = vld [vmem:[%s916_s2 + $0x58] sm:$0xff] }
   0xe   :  { %37 = vadd.xlane.f32.xlu0 %v18_v6  ;;  %53 = vadd.xlane.f32.xlu1 %v26_v7 }
   0xf   :  { %478 = vmatpush3.msra.mxu0 %v264_v16  ;;  %549 = vmatpush3.msra.mxu1 %v264_v16 }
  0x10   :  { %479 = vmatprep.subr.mxu0 %v263_v17  ;;  %534 = vmatprep.subr.mxu1 %v263_v17 }
  0x11   :  { %480 = vmatpush3.msra.mxu0 %v263_v17  ;;  %550 = vmatpush3.msra.mxu1 %v263_v17  ;;  %v257_v17 = vld [vmem:[%s916_s2 + $0x40] sm:$0xff] }
  0x12   :  { %39 = vadd.xlane.f32.xlu0 %v672_v8  ;;  %55 = vadd.xlane.f32.xlu1 %v677_v9 }
  0x13   :  { %481 = vmatprep.subr.mxu0 %v262_v50  ;;  %535 = vmatprep.subr.mxu1 %v262_v50 }
  0x14   :  { %482 = vmatpush3.msra.mxu0 %v262_v50  ;;  %551 = vmatpush3.msra.mxu1 %v262_v50 }
  0x15   :  { %483 = vmatprep.subr.mxu0 %v261_v54  ;;  %536 = vmatprep.subr.mxu1 %v261_v54 }
  0x16   :  { %41 = vadd.xlane.f32.xlu0 %v684_v10  ;;  %57 = vadd.xlane.f32.xlu1 %v689_v11 }
  0x17   :  { %484 = vmatpush3.msra.mxu0 %v261_v54  ;;  %552 = vmatpush3.msra.mxu1 %v261_v54 }
  0x18   :  { %485 = vmatprep.subr.mxu0 %v260_v63  ;;  %537 = vmatprep.subr.mxu1 %v260_v63 }
  0x19   :  { %486 = vmatpush3.msra.mxu0 %v260_v63  ;;  %553 = vmatpush3.msra.mxu1 %v260_v63 }
  0x1a   :  { %43 = vadd.xlane.f32.xlu0 %v696_v12  ;;  %59 = vadd.xlane.f32.xlu1 %v701_v13 }
  0x1e   :  { %45 = vadd.xlane.f32.xlu0 %v708_v14  ;;  %61 = vadd.xlane.f32.xlu1 %v713_v15 }
  0x8b   :  { %v32_v18 = vpop.xlane.xlu0 %31  ;;  %v34_v19 = vpop.xlane.xlu1 %33 }
  0x8c   :  { %v63_v20 = vmul.f32 0.0078125, %v32_v18  ;;  %v64_v21 = vmul.f32 0.0078125, %v34_v19 }
  0x8e   :  { %v723_v22 = vsub.f32 %v15_v0, %v63_v20  ;;  %v725_v23 = vsub.f32 %v16_v1, %v64_v21 }
  0x8f   :  { %v48_v24 = vpop.xlane.xlu0 %47  ;;  %v50_v25 = vpop.xlane.xlu1 %49 }
  0x90   :  { %v71_v26 = vmul.f32 0.0078125, %v48_v24  ;;  %v95_v27 = vmul.f32 %v723_v22, %v723_v22  ;;  %v72_v28 = vmul.f32 0.0078125, %v50_v25  ;;  %v96_v31 = vmul.f32 %v725_v23, %v725_v23 }
  0x92   :  { %v729_v29 = vsub.f32 %v23_v2, %v71_v26  ;;  %111 = vadd.xlane.f32.xlu0 %v95_v27  ;;  %v731_v30 = vsub.f32 %v24_v3, %v72_v28  ;;  %v259_v3 = vld [vmem:[%s916_s2 + $0x50] sm:$0xff] }
  0x93   :  { %v36_v32 = vpop.xlane.xlu0 %35  ;;  %v52_v33 = vpop.xlane.xlu1 %51  ;;  %487 = vmatprep.subr.mxu0 %v259_v3  ;;  %538 = vmatprep.subr.mxu1 %v259_v3  ;;  %v255_v28 = vld [vmem:[%s916_s2 + $0x30] sm:$0xff] }
  0x94   :  { %v65_v34 = vmul.f32 0.0078125, %v36_v32  ;;  %v103_v35 = vmul.f32 %v729_v29, %v729_v29  ;;  %v73_v36 = vmul.f32 0.0078125, %v52_v33  ;;  %v104_v39 = vmul.f32 %v731_v30, %v731_v30  ;;  %488 = vmatpush3.msra.mxu0 %v259_v3  ;;  %554 = vmatpush3.msra.mxu1 %v259_v3  ;;  %v252_v32 = vld [vmem:[%s916_s2 + $0x18] sm:$0xff]  ;;  %v251_v33 = vld [vmem:[%s916_s2 + $0x10] sm:$0xff] }
  0x96   :  { %v737_v37 = vsub.f32 %v17_v4, %v65_v34  ;;  %113 = vadd.xlane.f32.xlu0 %v96_v31  ;;  %127 = vadd.xlane.f32.xlu1 %v103_v35  ;;  %v739_v38 = vsub.f32 %v25_v5, %v73_v36  ;;  %v253_v31 = vld [vmem:[%s916_s2 + $0x20] sm:$0xff]  ;;  %v250_v34 = vld [vmem:[%s916_s2 + $0x8] sm:$0xff] }
  0x97   :  { %v38_v40 = vpop.xlane.xlu0 %37  ;;  %v54_v41 = vpop.xlane.xlu1 %53  ;;  %v249_v35 = vld [vmem:[%s916_s2] sm:$0xff] }
  0x98   :  { %v66_v42 = vmul.f32 0.0078125, %v38_v40  ;;  %v97_v43 = vmul.f32 %v737_v37, %v737_v37  ;;  %v74_v44 = vmul.f32 0.0078125, %v54_v41  ;;  %v105_v47 = vmul.f32 %v739_v38, %v739_v38 }
  0x9a   :  { %v745_v45 = vsub.f32 %v18_v6, %v66_v42  ;;  %129 = vadd.xlane.f32.xlu1 %v104_v39  ;;  %115 = vadd.xlane.f32.xlu0 %v97_v43  ;;  %v747_v46 = vsub.f32 %v26_v7, %v74_v44 }
  0x9b   :  { %v40_v48 = vpop.xlane.xlu0 %39  ;;  %v56_v49 = vpop.xlane.xlu1 %55 }
  0x9c   :  { %v67_v51 = vmul.f32 0.0078125, %v40_v48  ;;  %v98_v52 = vmul.f32 %v745_v45, %v745_v45  ;;  %v75_v53 = vmul.f32 0.0078125, %v56_v49  ;;  %v106_v57 = vmul.f32 %v747_v46, %v747_v46 }
  0x9e   :  { %v760_v55 = vsub.f32 %v672_v8, %v67_v51  ;;  %131 = vadd.xlane.f32.xlu1 %v105_v47  ;;  %117 = vadd.xlane.f32.xlu0 %v98_v52  ;;  %v763_v56 = vsub.f32 %v677_v9, %v75_v53  ;;  %v258_v9 = vld [vmem:[%s916_s2 + $0x48] sm:$0xff] }
  0x9f   :  { %v42_v58 = vpop.xlane.xlu0 %41  ;;  %v58_v59 = vpop.xlane.xlu1 %57  ;;  %489 = vmatprep.subr.mxu0 %v258_v9  ;;  %539 = vmatprep.subr.mxu1 %v258_v9 }
  0xa0   :  { %v68_v60 = vmul.f32 0.0078125, %v42_v58  ;;  %v99_v61 = vmul.f32 %v760_v55, %v760_v55  ;;  %v76_v62 = vmul.f32 0.0078125, %v58_v59  ;;  %v107_v2 = vmul.f32 %v763_v56, %v763_v56  ;;  %490 = vmatpush3.msra.mxu0 %v258_v9  ;;  %555 = vmatpush3.msra.mxu1 %v258_v9 }
  0xa1   :  { %491 = vmatprep.subr.mxu0 %v257_v17  ;;  %540 = vmatprep.subr.mxu1 %v257_v17 }
  0xa2   :  { %v773_v0 = vsub.f32 %v684_v10, %v68_v60  ;;  %133 = vadd.xlane.f32.xlu1 %v106_v57  ;;  %119 = vadd.xlane.f32.xlu0 %v99_v61  ;;  %v776_v1 = vsub.f32 %v689_v11, %v76_v62 }
  0xa3   :  { %v44_v4 = vpop.xlane.xlu0 %43  ;;  %v60_v5 = vpop.xlane.xlu1 %59  ;;  %492 = vmatpush3.msra.mxu0 %v257_v17  ;;  %556 = vmatpush3.msra.mxu1 %v257_v17 }
  0xa4   :  { %v69_v6 = vmul.f32 0.0078125, %v44_v4  ;;  %v100_v7 = vmul.f32 %v773_v0, %v773_v0  ;;  %v77_v8 = vmul.f32 0.0078125, %v60_v5  ;;  %v108_v16 = vmul.f32 %v776_v1, %v776_v1 }
  0xa6   :  { %v789_v10 = vsub.f32 %v696_v12, %v69_v6  ;;  %135 = vadd.xlane.f32.xlu1 %v107_v2  ;;  %121 = vadd.xlane.f32.xlu0 %v100_v7  ;;  %v792_v11 = vsub.f32 %v701_v13, %v77_v8  ;;  %v256_v13 = vld [vmem:[%s916_s2 + $0x38] sm:$0xff]  ;;  %v840_v6 = vld [vmem:[%s915_s1] ss:$0 sm:$0xff] }
  0xa7   :  { %v46_v18 = vpop.xlane.xlu0 %45  ;;  %v62_v19 = vpop.xlane.xlu1 %61  ;;  %493 = vmatprep.subr.mxu0 %v256_v13  ;;  %541 = vmatprep.subr.mxu1 %v256_v13 }
  0xa8   :  { %v70_v20 = vmul.f32 0.0078125, %v46_v18  ;;  %v101_v12 = vmul.f32 %v789_v10, %v789_v10  ;;  %v78_v21 = vmul.f32 0.0078125, %v62_v19  ;;  %v109_v26 = vmul.f32 %v792_v11, %v792_v11  ;;  %494 = vmatpush3.msra.mxu0 %v256_v13  ;;  %557 = vmatpush3.msra.mxu1 %v256_v13  ;;  %v846_v18 = vld [vmem:[%s915_s1 + $0x1] ss:$0 sm:$0xff]  ;;  %s622_s1 = smov [#allocation2]  }
  0xa9   :  { %495 = vmatprep.subr.mxu0 %v255_v28  ;;  %542 = vmatprep.subr.mxu1 %v255_v28  ;;  %s432_s23 = sshll.u32 %s622_s1, 4  ;;  %s433_s23 = int_to_ptr.vmem [resolvable:$true] %s432_s23 }
  0xaa   :  { %v805_v24 = vsub.f32 %v708_v14, %v70_v20  ;;  %137 = vadd.xlane.f32.xlu1 %v108_v16  ;;  %123 = vadd.xlane.f32.xlu0 %v101_v12  ;;  %v808_v25 = vsub.f32 %v713_v15, %v78_v21  ;;  %v254_v15 = vld [vmem:[%s916_s2 + $0x28] sm:$0xff]  ;;  %s600_s24 = scalar_lea.vmem %s433_s23, 2048  ;;  %p605_p1 = scmp.lt.s32.totalorder %s433_s23, %s433_s23 }
  0xab   :  { %496 = vmatpush3.msra.mxu0 %v255_v28  ;;  %558 = vmatpush3.msra.mxu1 %v255_v28  ;;  %p601_p0 = scmp.ne.s32.totalorder %s433_s23, %s600_s24  ;;  %p606_p2 = scmp.lt.s32.totalorder %s600_s24, %s600_s24 }
  0xac   :  { %v102_v27 = vmul.f32 %v805_v24, %v805_v24  ;;  %v110_v14 = vmul.f32 %v808_v25, %v808_v25  ;;  %497 = vmatprep.subr.mxu0 %v254_v15  ;;  %543 = vmatprep.subr.mxu1 %v254_v15 }
  0xad   :  { %498 = vmatpush3.msra.mxu0 %v254_v15  ;;  %559 = vmatpush3.msra.mxu1 %v254_v15  ;;  %p607_p3 = por %p606_p2, %p605_p1 }
  0xae   :  { %139 = vadd.xlane.f32.xlu1 %v109_v26  ;;  %125 = vadd.xlane.f32.xlu0 %v102_v27 }
  0xaf   :  { %499 = vmatprep.subr.mxu0 %v253_v31  ;;  %544 = vmatprep.subr.mxu1 %v253_v31  ;;  %p608_p4 = pnand %p607_p3, %p601_p0 }
  0xb0   :  { %500 = vmatpush3.msra.mxu0 %v253_v31  ;;  %560 = vmatpush3.msra.mxu1 %v253_v31 }
  0xb1   :  { %501 = vmatprep.subr.mxu0 %v252_v32  ;;  %545 = vmatprep.subr.mxu1 %v252_v32 }
  0xb2   :  { %141 = vadd.xlane.f32.xlu1 %v110_v14  ;;  %502 = vmatpush3.msra.mxu0 %v252_v32 }
  0xb3   :  { %503 = vmatprep.subr.mxu0 %v251_v33  ;;  %561 = vmatpush3.msra.mxu1 %v252_v32 }
  0xb4   :  { %504 = vmatpush3.msra.mxu0 %v251_v33  ;;  %546 = vmatprep.subr.mxu1 %v251_v33 }
  0xb5   :  { %505 = vmatprep.subr.mxu0 %v250_v34  ;;  %562 = vmatpush3.msra.mxu1 %v251_v33 }
  0xb6   :  { %506 = vmatpush3.msra.mxu0 %v250_v34  ;;  %547 = vmatprep.subr.mxu1 %v250_v34 }
  0xb7   :  { %507 = vmatprep.subr.mxu0 %v249_v35  ;;  %563 = vmatpush3.msra.mxu1 %v250_v34 }
  0xb8   :  { %508 = vmatpush3.msra.mxu0 %v249_v35  ;;  %548 = vmatprep.subr.mxu1 %v249_v35 }
  0xb9   :  { %564 = vmatpush3.msra.mxu1 %v249_v35 }
 0x11b   :  { %v112_v36 = vpop.xlane.xlu0 %111 }
 0x11c   :  { %v143_v39 = vmul.f32 0.0078125, %v112_v36 }
 0x11e   :  { %v159_v40 = vadd.f32 1e-05, %v143_v39 }
 0x11f   :  { %v128_v41 = vpop.xlane.xlu1 %127  ;;  %v114_v42 = vpop.xlane.xlu0 %113 }
 0x120   :  { %568 = vrsqrt.f32 %v159_v40  ;;  %v151_v43 = vmul.f32 0.0078125, %v128_v41  ;;  %v144_v44 = vmul.f32 0.0078125, %v114_v42 }
 0x122   :  { %v167_v47 = vadd.f32 1e-05, %v151_v43  ;;  %v160_v48 = vadd.f32 1e-05, %v144_v44 }
 0x123   :  { %v130_v49 = vpop.xlane.xlu1 %129  ;;  %v116_v50 = vpop.xlane.xlu0 %115 }
 0x124   :  { %570 = vrsqrt.f32 %v167_v47  ;;  %v152_v51 = vmul.f32 0.0078125, %v130_v49  ;;  %v145_v52 = vmul.f32 0.0078125, %v116_v50 }
 0x125   :  { %572 = vrsqrt.f32 %v160_v48 }
 0x126   :  { %v168_v53 = vadd.f32 1e-05, %v152_v51  ;;  %v161_v54 = vadd.f32 1e-05, %v145_v52 }
 0x127   :  { %v132_v57 = vpop.xlane.xlu1 %131  ;;  %v118_v58 = vpop.xlane.xlu0 %117 }
 0x128   :  { %574 = vrsqrt.f32 %v168_v53  ;;  %v153_v59 = vmul.f32 0.0078125, %v132_v57  ;;  %v146_v60 = vmul.f32 0.0078125, %v118_v58 }
 0x129   :  { %576 = vrsqrt.f32 %v161_v54 }
 0x12a   :  { %v169_v61 = vadd.f32 1e-05, %v153_v59  ;;  %v162_v62 = vadd.f32 1e-05, %v146_v60 }
 0x12b   :  { %v134_v63 = vpop.xlane.xlu1 %133  ;;  %v120_v2 = vpop.xlane.xlu0 %119 }
 0x12c   :  { %578 = vrsqrt.f32 %v169_v61  ;;  %v154_v3 = vmul.f32 0.0078125, %v134_v63  ;;  %v147_v4 = vmul.f32 0.0078125, %v120_v2 }
 0x12d   :  { %v569_v5 = vpop.eup %568  ;;  %580 = vrsqrt.f32 %v162_v62 }
 0x12e   :  { %v170_v7 = vadd.f32 1e-05, %v154_v3  ;;  %v163_v8 = vadd.f32 1e-05, %v147_v4  ;;  %v191_v9 = vmul.f32 %v569_v5, %v723_v22 }
 0x12f   :  { %v136_v16 = vpop.xlane.xlu1 %135  ;;  %v122_v17 = vpop.xlane.xlu0 %121 }
 0x130   :  { %582 = vrsqrt.f32 %v170_v7  ;;  %v155_v19 = vmul.f32 0.0078125, %v136_v16  ;;  %v148_v20 = vmul.f32 0.0078125, %v122_v17  ;;  %v212_v12 = vmul.f32 %v840_v6, %v191_v9 }
 0x131   :  { %v571_v21 = vpop.eup %570  ;;  %584 = vrsqrt.f32 %v163_v8 }
 0x132   :  { %v573_v13 = vpop.eup %572  ;;  %v171_v26 = vadd.f32 1e-05, %v155_v19  ;;  %v164_v27 = vadd.f32 1e-05, %v148_v20  ;;  %v233_v28 = vadd.f32 %v846_v18, %v212_v12  ;;  %v199_v22 = vmul.f32 %v571_v21, %v729_v29 }
 0x133   :  { %v138_v14 = vpop.xlane.xlu1 %137  ;;  %v124_v15 = vpop.xlane.xlu0 %123  ;;  %v192_v31 = vmul.f32 %v573_v13, %v725_v23 }
 0x134   :  { %586 = vrsqrt.f32 %v171_v26  ;;  %v156_v32 = vmul.f32 0.0078125, %v138_v14  ;;  %v149_v33 = vmul.f32 0.0078125, %v124_v15  ;;  %509 = vmatprep.mubr.f32.mxu0 %v233_v28  ;;  %v220_v34 = vmul.f32 %v840_v6, %v199_v22 }
 0x135   :  { %v575_v35 = vpop.eup %574  ;;  %588 = vrsqrt.f32 %v164_v27  ;;  %v213_v36 = vmul.f32 %v840_v6, %v192_v31 }
 0x136   :  { %v577_v39 = vpop.eup %576  ;;  %v172_v40 = vadd.f32 1e-05, %v156_v32  ;;  %v165_v41 = vadd.f32 1e-05, %v149_v33  ;;  %v241_v42 = vadd.f32 %v846_v18, %v220_v34  ;;  %v200_v29 = vmul.f32 %v575_v35, %v731_v30 }
 0x137   :  { %v140_v43 = vpop.xlane.xlu1 %139  ;;  %v126_v44 = vpop.xlane.xlu0 %125  ;;  %v234_v23 = vadd.f32 %v846_v18, %v213_v36  ;;  %v193_v47 = vmul.f32 %v577_v39, %v737_v37 }
 0x138   :  { %590 = vrsqrt.f32 %v172_v40  ;;  %v157_v48 = vmul.f32 0.0078125, %v140_v43  ;;  %v150_v49 = vmul.f32 0.0078125, %v126_v44  ;;  %521 = vmatprep.mubr.f32.mxu1 %v241_v42  ;;  %v221_v50 = vmul.f32 %v840_v6, %v200_v29 }
 0x139   :  { %v579_v51 = vpop.eup %578  ;;  %592 = vrsqrt.f32 %v165_v41  ;;  %510 = vmatmul.mubr.f32.vlgmr.msra.gmra.mxu0 %v234_v23  ;;  %v214_v52 = vmul.f32 %v840_v6, %v193_v47 }
 0x13a   :  { %v581_v53 = vpop.eup %580  ;;  %v173_v54 = vadd.f32 1e-05, %v157_v48  ;;  %v166_v30 = vadd.f32 1e-05, %v150_v49  ;;  %v242_v57 = vadd.f32 %v846_v18, %v221_v50  ;;  %v201_v58 = vmul.f32 %v579_v51, %v739_v38 }
 0x13b   :  { %v142_v59 = vpop.xlane.xlu1 %141  ;;  %v235_v37 = vadd.f32 %v846_v18, %v214_v52  ;;  %v194_v60 = vmul.f32 %v581_v53, %v745_v45 }
 0x13c   :  { %594 = vrsqrt.f32 %v173_v54  ;;  %v158_v61 = vmul.f32 0.0078125, %v142_v59  ;;  %522 = vmatmul.mubr.f32.vlgmr.msra.gmra.mxu1 %v242_v57  ;;  %v222_v62 = vmul.f32 %v840_v6, %v201_v58 }
 0x13d   :  { %v583_v63 = vpop.eup %582  ;;  %596 = vrsqrt.f32 %v166_v30  ;;  %512 = vmatprep.mubr.f32.mxu0 %v235_v37  ;;  %v215_v2 = vmul.f32 %v840_v6, %v194_v60 }
 0x13e   :  { %v585_v3 = vpop.eup %584  ;;  %v174_v4 = vadd.f32 1e-05, %v158_v61  ;;  %v243_v5 = vadd.f32 %v846_v18, %v222_v62  ;;  %v202_v38 = vmul.f32 %v583_v63, %v747_v46 }
 0x13f   :  { %v236_v7 = vadd.f32 %v846_v18, %v215_v2  ;;  %v195_v45 = vmul.f32 %v585_v3, %v760_v55 }
 0x140   :  { %598 = vrsqrt.f32 %v174_v4  ;;  %524 = vmatprep.mubr.f32.mxu1 %v243_v5  ;;  %v223_v8 = vmul.f32 %v840_v6, %v202_v38 }
 0x141   :  { %v587_v9 = vpop.eup %586  ;;  %513 = vmatmul.mubr.f32.gmra.mxu0 %v236_v7  ;;  %v216_v16 = vmul.f32 %v840_v6, %v195_v45 }
 0x142   :  { %v589_v17 = vpop.eup %588  ;;  %v244_v19 = vadd.f32 %v846_v18, %v223_v8  ;;  %v203_v20 = vmul.f32 %v587_v9, %v763_v56 }
 0x143   :  { %v237_v12 = vadd.f32 %v846_v18, %v216_v16  ;;  %v196_v46 = vmul.f32 %v589_v17, %v773_v0 }
 0x144   :  { %525 = vmatmul.mubr.f32.gmra.mxu1 %v244_v19  ;;  %v224_v55 = vmul.f32 %v840_v6, %v203_v20 }
 0x145   :  { %v591_v21 = vpop.eup %590  ;;  %515 = vmatprep.mubr.f32.mxu0 %v237_v12  ;;  %v217_v13 = vmul.f32 %v840_v6, %v196_v46 }
 0x146   :  { %v593_v26 = vpop.eup %592  ;;  %v245_v27 = vadd.f32 %v846_v18, %v224_v55  ;;  %v204_v28 = vmul.f32 %v591_v21, %v776_v1 }
 0x147   :  { %v238_v22 = vadd.f32 %v846_v18, %v217_v13  ;;  %v197_v56 = vmul.f32 %v593_v26, %v789_v10 }
 0x148   :  { %527 = vmatprep.mubr.f32.mxu1 %v245_v27  ;;  %v225_v14 = vmul.f32 %v840_v6, %v204_v28 }
 0x149   :  { %v595_v0 = vpop.eup %594  ;;  %516 = vmatmul.mubr.f32.gmra.mxu0 %v238_v22  ;;  %v218_v15 = vmul.f32 %v840_v6, %v197_v56 }
 0x14a   :  { %v597_v31 = vpop.eup %596  ;;  %v246_v32 = vadd.f32 %v846_v18, %v225_v14  ;;  %v205_v33 = vmul.f32 %v595_v0, %v792_v11 }
 0x14b   :  { %v239_v34 = vadd.f32 %v846_v18, %v218_v15  ;;  %v198_v1 = vmul.f32 %v597_v31, %v805_v24 }
 0x14c   :  { %528 = vmatmul.mubr.f32.gmra.mxu1 %v246_v32  ;;  %v226_v35 = vmul.f32 %v840_v6, %v205_v33 }
 0x14d   :  { %v599_v10 = vpop.eup %598  ;;  %518 = vmatprep.mubr.f32.mxu0 %v239_v34  ;;  %v219_v36 = vmul.f32 %v840_v6, %v198_v1 }
 0x14e   :  { %v247_v39 = vadd.f32 %v846_v18, %v226_v35  ;;  %v206_v40 = vmul.f32 %v599_v10, %v808_v25 }
 0x14f   :  { %v240_v41 = vadd.f32 %v846_v18, %v219_v36 }
 0x150   :  { %530 = vmatprep.mubr.f32.mxu1 %v247_v39  ;;  %v227_v11 = vmul.f32 %v840_v6, %v206_v40 }
 0x151   :  { %519 = vmatmul.mubr.f32.gmra.mxu0 %v240_v41 }
 0x152   :  { %v248_v42 = vadd.f32 %v846_v18, %v227_v11 }
 0x154   :  { %531 = vmatmul.mubr.f32.gmra.mxu1 %v248_v42 }
 0x1f9   :  { %v511_v24 = vpop.f32.mrf.mxu0 }
 0x1fa   :  { %412 = vst.msk [vmem:[#allocation2 + $0x8] sm:$0xff] %vm410_vm0, %v511_v24 }
 0x1fb   :  { %v331_v29 = vpop.f32.mrf.mxu0 }
 0x1fc   :  { %411 = vst.msk [vmem:[#allocation2] sm:$0xff] %vm410_vm0, %v331_v29  ;;  %v523_v43 = vpop.f32.mrf.mxu1 }
 0x1fd   :  { %420 = vst.msk [vmem:[#allocation2 + $0x48] sm:$0xff] %vm410_vm0, %v523_v43 }
 0x1fe   :  { %v371_v25 = vpop.f32.mrf.mxu1 }
 0x1ff   :  { %419 = vst.msk [vmem:[#allocation2 + $0x40] sm:$0xff] %vm410_vm0, %v371_v25 }
 0x201   :  { %v514_v44 = vpop.f32.mrf.mxu0 }
 0x202   :  { %414 = vst.msk [vmem:[#allocation2 + $0x18] sm:$0xff] %vm410_vm0, %v514_v44 }
 0x203   :  { %v341_v6 = vpop.f32.mrf.mxu0 }
 0x204   :  { %413 = vst.msk [vmem:[#allocation2 + $0x10] sm:$0xff] %vm410_vm0, %v341_v6  ;;  %v526_v18 = vpop.f32.mrf.mxu1 }
 0x205   :  { %422 = vst.msk [vmem:[#allocation2 + $0x58] sm:$0xff] %vm410_vm0, %v526_v18 }
 0x206   :  { %v381_v23 = vpop.f32.mrf.mxu1 }
 0x207   :  { %421 = vst.msk [vmem:[#allocation2 + $0x50] sm:$0xff] %vm410_vm0, %v381_v23 }
 0x209   :  { %v517_v47 = vpop.f32.mrf.mxu0 }
 0x20a   :  { %416 = vst.msk [vmem:[#allocation2 + $0x28] sm:$0xff] %vm410_vm0, %v517_v47 }
 0x20b   :  { %v351_v48 = vpop.f32.mrf.mxu0 }
 0x20c   :  { %415 = vst.msk [vmem:[#allocation2 + $0x20] sm:$0xff] %vm410_vm0, %v351_v48  ;;  %v529_v49 = vpop.f32.mrf.mxu1 }
 0x20d   :  { %424 = vst.msk [vmem:[#allocation2 + $0x68] sm:$0xff] %vm410_vm0, %v529_v49 }
 0x20e   :  { %v391_v50 = vpop.f32.mrf.mxu1 }
 0x20f   :  { %423 = vst.msk [vmem:[#allocation2 + $0x60] sm:$0xff] %vm410_vm0, %v391_v50 }
 0x211   :  { %v520_v51 = vpop.f32.mrf.mxu0 }
 0x212   :  { %418 = vst.msk [vmem:[#allocation2 + $0x38] sm:$0xff] %vm410_vm0, %v520_v51 }
 0x213   :  { %v361_v52 = vpop.f32.mrf.mxu0 }
 0x214   :  { %417 = vst.msk [vmem:[#allocation2 + $0x30] sm:$0xff] %vm410_vm0, %v361_v52  ;;  %v532_v53 = vpop.f32.mrf.mxu1 }
 0x215   :  { %426 = vst.msk [vmem:[#allocation2 + $0x78] sm:$0xff] %vm410_vm0, %v532_v53 }
 0x216   :  { %v401_v54 = vpop.f32.mrf.mxu1 }
 0x217   :  { %425 = vst.msk [vmem:[#allocation2 + $0x70] sm:$0xff] %vm410_vm0, %v401_v54 }
 0x218   :  { %611 = shalt.err (!%p608_p4)
}
 0x219   :  { %s623_s25 = smov 128   ;;  %s624_s26 = smov 8  }
 0x21a   :  { %438 = dma.vmem_to_hbm [thread:$0]  %s433_s23, 2048, %s917_s3, [#allocation3], %s623_s25, %s623_s25, %s624_s26  }
 0x21b   :  { %620 = dma.done.wait [#allocation3], 2048  }
 0x21c   :  { %621 = vsyncadd [#allocation3], 4294965248 }
 0x21d   :  { %442 = vsyncpa [#allocation3], 1 }

</bundles_post_ra>
